<compile_context>
chip_gen: v5e
topology: v5e:2x2
jax: 0.10.0
libtpu: 0.0.40
codegen_flags: <defaults>
</compile_context>

<pallas_src>
import functools

import jax
import jax.numpy as jnp
from jax import lax
from jax.experimental import pallas as pl
from jax.experimental.pallas import tpu as pltpu


_PAD0 = 128  # aligned lane offset at which the flattened strip is staged in scratch


def _inverted_residual_kernel(x_ref, w1_ref, b1_ref, wd_ref, b2_ref,
                              w3_ref, b3_ref, *rest,
                              H, W, TH, stride, expand, use_shortcut):
    if stride == 1:
        out_ref, hp_ref = rest
        sub_ref = None
    else:
        sub_ref, out_ref, hp_ref = rest

    C = wd_ref.shape[0]                    # hidden channels
    W2 = (W - 1) // stride + 1
    T1 = (TH - 1) * stride + 1             # stride-1 depthwise rows computed
    R = T1 + 2                             # expanded rows needed (incl. halo)
    L = R * W                              # flattened window length
    L1 = T1 * W
    Lout = TH * W2

    s = pl.program_id(1)
    row0 = s * (TH * stride)               # first padded-x row of this window

    xw = x_ref[0, 0].astype(jnp.float32)   # (Cin, L), lane-dense

    # ---- expand: 1x1 conv (BN folded into w1) + bias + ReLU6 ----------------
    if expand:
        h = jnp.dot(w1_ref[...], xw, preferred_element_type=jnp.float32)
        h = jnp.clip(h + b1_ref[...], 0.0, 6.0)          # (C, L)
    else:
        h = xw

    # Depthwise zero padding: zero window rows that fall outside the real image.
    posr = lax.broadcasted_iota(jnp.int32, (C, L), 1)
    lo = jnp.where(s == 0, W, 0)           # top halo row only exists for strip 0
    hi = (H + 1 - row0) * W                # rows past the bottom image edge
    h = jnp.where((posr >= lo) & (posr < hi), h, 0.0)

    # ---- depthwise 3x3 (BN folded into wd) + bias + ReLU6 -------------------
    # Stage the flattened strip at an aligned lane offset; each (di, dj) tap is a
    # static lane-offset slice of the scratch.  Lanes outside [_PAD0, _PAD0+L) are
    # only ever read at masked border positions, so no memset is required.
    hp_ref[:, pl.ds(_PAD0, L)] = h

    posw = lax.broadcasted_iota(jnp.int32, (C, L1), 1)
    if (W & (W - 1)) == 0:
        colw = posw & (W - 1)              # column index of each lane (pow-2 W)
    else:
        colw = lax.broadcasted_iota(jnp.int32, (C, T1, W), 2).reshape(C, L1)

    acc = jnp.zeros((C, L1), jnp.float32)
    for di in range(3):
        for dj in range(3):
            k = di * W + dj - 1            # flat shift of this tap
            tap = hp_ref[:, pl.ds(_PAD0 + k, L1)]
            if dj == 0:                    # left border wrapped -> zero it
                tap = jnp.where(colw != 0, tap, 0.0)
            elif dj == 2:                  # right border wrapped -> zero it
                tap = jnp.where(colw != W - 1, tap, 0.0)
            idx = di * 3 + dj
            acc = acc + tap * wd_ref[:, idx:idx + 1]
    acc = jnp.clip(acc + b2_ref[...], 0.0, 6.0)

    # ---- project: 1x1 conv (BN folded into w3) + bias, no activation --------
    y = jnp.dot(w3_ref[...], acc, preferred_element_type=jnp.float32)
    y = y + b3_ref[...]                    # (Cout, L1)

    if stride != 1:
        # stride-2 row/col subsampling as one small selection matmul
        y = jnp.dot(y, sub_ref[...], preferred_element_type=jnp.float32)

    if use_shortcut:                       # stride == 1 and Cin == Cout
        y = y + xw[:, W:W + Lout]          # window rows 1..TH == this strip's rows

    out_ref[0] = y.astype(out_ref.dtype)


def _pick_strip_rows(H2, W2):
    """Smallest divisor of H2 whose output strip is lane-dense (multiple of 128)."""
    for th in range(1, H2 + 1):
        if H2 % th == 0 and (th * W2) % 128 == 0:
            return th
    return H2


def _subsample_matrix(T1, TH, W, W2, stride):
    dst = jnp.arange(TH * W2)
    src = (jnp.arange(TH)[:, None] * stride * W
           + jnp.arange(W2)[None, :] * stride).reshape(-1)
    return jnp.zeros((T1 * W, TH * W2), jnp.float32).at[src, dst].set(1.0)


def inverted_residual(x_nchw, folded_params, *, stride, expand_ratio, out_planes):
    N, Cin, H, W = x_nchw.shape
    Chid = int(Cin * expand_ratio)
    H2 = (H - 1) // stride + 1
    W2 = (W - 1) // stride + 1
    use_shortcut = stride == 1 and Cin == out_planes
    expand = expand_ratio != 1

    TH = _pick_strip_rows(H2, W2)
    n_strips = H2 // TH
    T1 = (TH - 1) * stride + 1
    L = (T1 + 2) * W
    L1 = T1 * W
    Lout = TH * W2

    # Zero-pad H by 1 (depthwise halo), flatten spatial, and materialize the
    # (slightly overlapping) per-strip windows so the kernel's x block is a plain
    # lane-dense slab (layout plumbing only; ~1.25x duplication of tiny Cin data).
    x_pad = jnp.pad(x_nchw, ((0, 0), (0, 0), (1, 1), (0, 0)))
    x_flat = x_pad.reshape(N, Cin, (H + 2) * W)
    x_win = jnp.stack(
        [lax.slice_in_dim(x_flat, s * TH * stride * W,
                          s * TH * stride * W + L, axis=2)
         for s in range(n_strips)], axis=1)              # (N, n_strips, Cin, L)

    w1f, b1, wdf, b2, w3f, b3 = folded_params
    operands = [x_win, w1f, b1, wdf, b2, w3f, b3]
    in_specs = [
        pl.BlockSpec((1, 1, Cin, L), lambda n, s: (n, s, 0, 0)),
        # weights / biases: constant block index -> fetched once, stay resident
        pl.BlockSpec((Chid, Cin), lambda n, s: (0, 0)),
        pl.BlockSpec((Chid, 1), lambda n, s: (0, 0)),
        pl.BlockSpec((Chid, 9), lambda n, s: (0, 0)),
        pl.BlockSpec((Chid, 1), lambda n, s: (0, 0)),
        pl.BlockSpec((out_planes, Chid), lambda n, s: (0, 0)),
        pl.BlockSpec((out_planes, 1), lambda n, s: (0, 0)),
    ]
    if stride != 1:
        operands.append(_subsample_matrix(T1, TH, W, W2, stride))
        in_specs.append(pl.BlockSpec((L1, Lout), lambda n, s: (0, 0)))

    scratch_w = _PAD0 + ((L + 1 + 127) // 128) * 128
    kernel = functools.partial(
        _inverted_residual_kernel, H=H, W=W, TH=TH, stride=stride,
        expand=expand, use_shortcut=use_shortcut)

    out_flat = pl.pallas_call(
        kernel,
        out_shape=jax.ShapeDtypeStruct((N, out_planes, H2 * W2), x_nchw.dtype),
        grid_spec=pltpu.PrefetchScalarGridSpec(
            num_scalar_prefetch=0,
            grid=(N, n_strips),
            in_specs=in_specs,
            out_specs=pl.BlockSpec((1, out_planes, Lout), lambda n, s: (n, 0, s)),
            scratch_shapes=[pltpu.VMEM((Chid, scratch_w), jnp.float32)],
        ),
        compiler_params=pltpu.CompilerParams(
            dimension_semantics=("parallel", "parallel"),
            vmem_limit_bytes=32 * 1024 * 1024),
    )(*operands)
    return out_flat.reshape(N, out_planes, H2, W2)


# ----------------------------- parameters & reference ---------------------------

def make_raw_params(key, in_planes, out_planes, expand_ratio):
    """Random PyTorch-style raw parameters (conv weights + BN stats)."""
    Chid = int(in_planes * expand_ratio)
    ks = jax.random.split(key, 6)

    def bn(k, c):
        kg, kb, km, kv = jax.random.split(k, 4)
        gamma = jax.random.uniform(kg, (c,), jnp.float32, 0.5, 1.5)
        beta = 0.1 * jax.random.normal(kb, (c,), jnp.float32)
        mean = 0.1 * jax.random.normal(km, (c,), jnp.float32)
        var = jax.random.uniform(kv, (c,), jnp.float32, 0.5, 1.5)
        return (gamma, beta, mean, var)

    w1 = 0.3 * jax.random.normal(ks[0], (Chid, in_planes), jnp.float32)
    wd = 0.3 * jax.random.normal(ks[2], (Chid, 3, 3), jnp.float32)
    w3 = 0.3 * jax.random.normal(ks[4], (out_planes, Chid), jnp.float32)
    return (w1, bn(ks[1], Chid), wd, bn(ks[3], Chid), w3, bn(ks[5], out_planes))


def fold_params(raw_params, eps=1e-5):
    """Fold eval-mode BN scale into the conv weights; keep only biases."""
    w1, bn1, wd, bn2, w3, bn3 = raw_params

    def fold(p):
        g, b, m, v = p
        s = g / jnp.sqrt(v + eps)
        return s, b - m * s

    s1, b1 = fold(bn1)
    s2, b2 = fold(bn2)
    s3, b3 = fold(bn3)
    w1f = w1 * s1[:, None]                               # (Chid, Cin)
    wdf = (wd * s2[:, None, None]).reshape(wd.shape[0], 9)  # (Chid, 9)
    w3f = w3 * s3[:, None]                               # (Cout, Chid)
    return (w1f, b1[:, None], wdf, b2[:, None], w3f, b3[:, None])


def reference_nchw(x, raw_params, *, stride, expand_ratio, out_planes, eps=1e-5):
    """Pure-JAX NCHW reference mirroring the PyTorch module (eval-mode BN)."""
    w1, bn1, wd, bn2, w3, bn3 = raw_params
    Cin = x.shape[1]
    Chid = int(Cin * expand_ratio)
    dn = ('NCHW', 'OIHW', 'NCHW')

    def bn(h, p):
        g, b, m, v = p
        return ((h - m[None, :, None, None])
                / jnp.sqrt(v + eps)[None, :, None, None]
                * g[None, :, None, None] + b[None, :, None, None])

    h = x
    if expand_ratio != 1:
        h = lax.conv_general_dilated(h, w1.reshape(Chid, Cin, 1, 1), (1, 1),
                                     ((0, 0), (0, 0)), dimension_numbers=dn)
        h = jnp.clip(bn(h, bn1), 0.0, 6.0)
    h = lax.conv_general_dilated(h, wd.reshape(Chid, 1, 3, 3), (stride, stride),
                                 ((1, 1), (1, 1)), dimension_numbers=dn,
                                 feature_group_count=Chid)
    h = jnp.clip(bn(h, bn2), 0.0, 6.0)
    y = lax.conv_general_dilated(h, w3.reshape(out_planes, Chid, 1, 1), (1, 1),
                                 ((0, 0), (0, 0)), dimension_numbers=dn)
    y = bn(y, bn3)
    if stride == 1 and Cin == out_planes:
        y = y + x
    return y


if __name__ == "__main__":
    # Module config: InvertedResidual(in_planes=4, out_planes=4, stride=1,
    #                                 expand_ratio=2), input NCHW (2, 4, 16, 16).
    N, Cin, H, W = 2, 4, 16, 16
    out_planes, stride, expand_ratio = 4, 1, 2

    key = jax.random.PRNGKey(0)
    kx, kp = jax.random.split(key)
    x = jax.random.normal(kx, (N, Cin, H, W), jnp.float32)   # PyTorch NCHW layout
    raw = make_raw_params(kp, Cin, out_planes, expand_ratio)
    folded = fold_params(raw)

    out = inverted_residual(x, folded, stride=stride,
                            expand_ratio=expand_ratio, out_planes=out_planes)
    out = jax.block_until_ready(out)

    H2 = (H - 1) // stride + 1
    W2 = (W - 1) // stride + 1
    ref = reference_nchw(x, raw, stride=stride, expand_ratio=expand_ratio,
                         out_planes=out_planes)
    assert out.shape == (N, out_planes, H2, W2)
    assert jnp.allclose(out, ref, atol=5e-4, rtol=5e-4), \
        float(jnp.max(jnp.abs(out - ref)))
    print("KERNEL_OK")
</pallas_src>

<mosaic_0001>
module attributes {stable_mosaic.version = 11 : i64} {
  func.func @_inverted_residual_kernel(%arg0: i32, %arg1: i32, %arg2: memref<1x1x4x160xf32, #tpu.memory_space<vmem>>, %arg3: memref<8x4xf32, #tpu.memory_space<vmem>>, %arg4: memref<8x1xf32, #tpu.memory_space<vmem>>, %arg5: memref<8x9xf32, #tpu.memory_space<vmem>>, %arg6: memref<8x1xf32, #tpu.memory_space<vmem>>, %arg7: memref<4x8xf32, #tpu.memory_space<vmem>>, %arg8: memref<4x1xf32, #tpu.memory_space<vmem>>, %arg9: memref<1x4x128xf32, #tpu.memory_space<vmem>>, %arg10: memref<8x384xf32, #tpu.memory_space<vmem>>) attributes {dimension_semantics = [#tpu.dimension_semantics<parallel>, #tpu.dimension_semantics<parallel>], iteration_bounds = array<i64: 2, 2>, scalar_prefetch = 0 : i64, scratch_operands = 1 : i64, tpu.core_type = #tpu.core_type<tc>, window_params = [{transform_indices = @transform_0, window_bounds = array<i64: 1, 1, 4, 160>}, {pipeline_mode = #tpu.pipeline_mode<synchronous>, transform_indices = @transform_1, window_bounds = array<i64: 8, 4>}, {pipeline_mode = #tpu.pipeline_mode<synchronous>, transform_indices = @transform_2, window_bounds = array<i64: 8, 1>}, {pipeline_mode = #tpu.pipeline_mode<synchronous>, transform_indices = @transform_3, window_bounds = array<i64: 8, 9>}, {pipeline_mode = #tpu.pipeline_mode<synchronous>, transform_indices = @transform_4, window_bounds = array<i64: 8, 1>}, {pipeline_mode = #tpu.pipeline_mode<synchronous>, transform_indices = @transform_5, window_bounds = array<i64: 4, 8>}, {pipeline_mode = #tpu.pipeline_mode<synchronous>, transform_indices = @transform_6, window_bounds = array<i64: 4, 1>}, {transform_indices = @transform_7, window_bounds = array<i64: 1, 4, 128>}]} {
    %c8_i32 = arith.constant 8 : i32
    %0 = arith.muli %arg1, %c8_i32 : i32
    %c0 = arith.constant 0 : index
    %c0_0 = arith.constant 0 : index
    %c0_1 = arith.constant 0 : index
    %c0_2 = arith.constant 0 : index
    %1 = vector.load %arg2[%c0, %c0_0, %c0_1, %c0_2] : memref<1x1x4x160xf32, #tpu.memory_space<vmem>>, vector<1x1x4x160xf32>
    %2 = vector.shape_cast %1 : vector<1x1x4x160xf32> to vector<4x160xf32>
    %c0_3 = arith.constant 0 : index
    %c0_4 = arith.constant 0 : index
    %3 = vector.load %arg3[%c0_3, %c0_4] : memref<8x4xf32, #tpu.memory_space<vmem>>, vector<8x4xf32>
    %cst = arith.constant dense<0.000000e+00> : vector<8x160xf32>
    %4 = tpu.matmul %3, %2, %cst {dimension_numbers = #tpu.dot_dimension_numbers<[1], [0], [0], [1], [0, 0, 1, 1], [], []>} : vector<8x4xf32>, vector<4x160xf32>, vector<8x160xf32> -> vector<8x160xf32>
    %c0_5 = arith.constant 0 : index
    %c0_6 = arith.constant 0 : index
    %5 = vector.load %arg4[%c0_5, %c0_6] : memref<8x1xf32, #tpu.memory_space<vmem>>, vector<8x1xf32>
    %6 = vector.broadcast %5 : vector<8x1xf32> to vector<8x160xf32>
    %7 = arith.addf %4, %6 : vector<8x160xf32>
    %cst_7 = arith.constant 0.000000e+00 : f32
    %cst_8 = arith.constant 6.000000e+00 : f32
    %8 = vector.broadcast %cst_7 : f32 to vector<8x160xf32>
    %9 = arith.maximumf %8, %7 : vector<8x160xf32>
    %10 = vector.broadcast %cst_8 : f32 to vector<8x160xf32>
    %11 = arith.minimumf %10, %9 : vector<8x160xf32>
    %12 = tpu.iota {dimensions = array<i32: 1>} : vector<8x160xi32>
    %c0_i32 = arith.constant 0 : i32
    %13 = arith.cmpi eq, %arg1, %c0_i32 : i32
    %c16_i32 = arith.constant 16 : i32
    %c0_i32_9 = arith.constant 0 : i32
    %14 = arith.select %13, %c16_i32, %c0_i32_9 : i32
    %c17_i32 = arith.constant 17 : i32
    %15 = arith.subi %c17_i32, %0 : i32
    %c16_i32_10 = arith.constant 16 : i32
    %16 = arith.muli %15, %c16_i32_10 : i32
    %17 = vector.broadcast %14 : i32 to vector<8x160xi32>
    %18 = arith.cmpi sge, %12, %17 : vector<8x160xi32>
    %19 = vector.broadcast %16 : i32 to vector<8x160xi32>
    %20 = arith.cmpi slt, %12, %19 : vector<8x160xi32>
    %21 = arith.andi %18, %20 : vector<8x160xi1>
    %cst_11 = arith.constant 0.000000e+00 : f32
    %22 = vector.broadcast %cst_11 : f32 to vector<8x160xf32>
    %23 = arith.select %21, %11, %22 : vector<8x160xi1>, vector<8x160xf32>
    %c0_12 = arith.constant 0 : index
    %c128 = arith.constant 128 : index
    %24 = vector.load %arg10[%c0_12, %c128] : memref<8x384xf32, #tpu.memory_space<vmem>>, vector<8x160xf32>
    tpu.vector_store %arg10[%c0_12, %c128], %23 {strides = array<i32>} : memref<8x384xf32, #tpu.memory_space<vmem>>, vector<8x160xf32>,
    %25 = tpu.iota {dimensions = array<i32: 1>} : vector<8x128xi32>
    %c15_i32 = arith.constant 15 : i32
    %26 = vector.broadcast %c15_i32 : i32 to vector<8x128xi32>
    %27 = arith.andi %25, %26 : vector<8x128xi32>
    %cst_13 = arith.constant 0.000000e+00 : f32
    %28 = vector.broadcast %cst_13 : f32 to vector<8x128xf32>
    %c0_14 = arith.constant 0 : index
    %c127 = arith.constant 127 : index
    %29 = vector.load %arg10[%c0_14, %c127] : memref<8x384xf32, #tpu.memory_space<vmem>>, vector<8x128xf32>
    %c0_i32_15 = arith.constant 0 : i32
    %30 = vector.broadcast %c0_i32_15 : i32 to vector<8x128xi32>
    %31 = arith.cmpi ne, %27, %30 : vector<8x128xi32>
    %cst_16 = arith.constant 0.000000e+00 : f32
    %32 = vector.broadcast %cst_16 : f32 to vector<8x128xf32>
    %33 = arith.select %31, %29, %32 : vector<8x128xi1>, vector<8x128xf32>
    %c0_17 = arith.constant 0 : index
    %c0_18 = arith.constant 0 : index
    %34 = vector.load %arg5[%c0_17, %c0_18] : memref<8x9xf32, #tpu.memory_space<vmem>>, vector<8x1xf32>
    %35 = vector.broadcast %34 : vector<8x1xf32> to vector<8x128xf32>
    %36 = arith.mulf %33, %35 : vector<8x128xf32>
    %37 = arith.addf %28, %36 : vector<8x128xf32>
    %c0_19 = arith.constant 0 : index
    %c128_20 = arith.constant 128 : index
    %38 = vector.load %arg10[%c0_19, %c128_20] : memref<8x384xf32, #tpu.memory_space<vmem>>, vector<8x128xf32>
    %c0_21 = arith.constant 0 : index
    %c1 = arith.constant 1 : index
    %39 = vector.load %arg5[%c0_21, %c1] : memref<8x9xf32, #tpu.memory_space<vmem>>, vector<8x1xf32>
    %40 = vector.broadcast %39 : vector<8x1xf32> to vector<8x128xf32>
    %41 = arith.mulf %38, %40 : vector<8x128xf32>
    %42 = arith.addf %37, %41 : vector<8x128xf32>
    %c0_22 = arith.constant 0 : index
    %c129 = arith.constant 129 : index
    %43 = vector.load %arg10[%c0_22, %c129] : memref<8x384xf32, #tpu.memory_space<vmem>>, vector<8x128xf32>
    %c15_i32_23 = arith.constant 15 : i32
    %44 = vector.broadcast %c15_i32_23 : i32 to vector<8x128xi32>
    %45 = arith.cmpi ne, %27, %44 : vector<8x128xi32>
    %cst_24 = arith.constant 0.000000e+00 : f32
    %46 = vector.broadcast %cst_24 : f32 to vector<8x128xf32>
    %47 = arith.select %45, %43, %46 : vector<8x128xi1>, vector<8x128xf32>
    %c0_25 = arith.constant 0 : index
    %c2 = arith.constant 2 : index
    %48 = vector.load %arg5[%c0_25, %c2] : memref<8x9xf32, #tpu.memory_space<vmem>>, vector<8x1xf32>
    %49 = vector.broadcast %48 : vector<8x1xf32> to vector<8x128xf32>
    %50 = arith.mulf %47, %49 : vector<8x128xf32>
    %51 = arith.addf %42, %50 : vector<8x128xf32>
    %c0_26 = arith.constant 0 : index
    %c143 = arith.constant 143 : index
    %52 = vector.load %arg10[%c0_26, %c143] : memref<8x384xf32, #tpu.memory_space<vmem>>, vector<8x128xf32>
    %c0_i32_27 = arith.constant 0 : i32
    %53 = vector.broadcast %c0_i32_27 : i32 to vector<8x128xi32>
    %54 = arith.cmpi ne, %27, %53 : vector<8x128xi32>
    %cst_28 = arith.constant 0.000000e+00 : f32
    %55 = vector.broadcast %cst_28 : f32 to vector<8x128xf32>
    %56 = arith.select %54, %52, %55 : vector<8x128xi1>, vector<8x128xf32>
    %c0_29 = arith.constant 0 : index
    %c3 = arith.constant 3 : index
    %57 = vector.load %arg5[%c0_29, %c3] : memref<8x9xf32, #tpu.memory_space<vmem>>, vector<8x1xf32>
    %58 = vector.broadcast %57 : vector<8x1xf32> to vector<8x128xf32>
    %59 = arith.mulf %56, %58 : vector<8x128xf32>
    %60 = arith.addf %51, %59 : vector<8x128xf32>
    %c0_30 = arith.constant 0 : index
    %c144 = arith.constant 144 : index
    %61 = vector.load %arg10[%c0_30, %c144] : memref<8x384xf32, #tpu.memory_space<vmem>>, vector<8x128xf32>
    %c0_31 = arith.constant 0 : index
    %c4 = arith.constant 4 : index
    %62 = vector.load %arg5[%c0_31, %c4] : memref<8x9xf32, #tpu.memory_space<vmem>>, vector<8x1xf32>
    %63 = vector.broadcast %62 : vector<8x1xf32> to vector<8x128xf32>
    %64 = arith.mulf %61, %63 : vector<8x128xf32>
    %65 = arith.addf %60, %64 : vector<8x128xf32>
    %c0_32 = arith.constant 0 : index
    %c145 = arith.constant 145 : index
    %66 = vector.load %arg10[%c0_32, %c145] : memref<8x384xf32, #tpu.memory_space<vmem>>, vector<8x128xf32>
    %c15_i32_33 = arith.constant 15 : i32
    %67 = vector.broadcast %c15_i32_33 : i32 to vector<8x128xi32>
    %68 = arith.cmpi ne, %27, %67 : vector<8x128xi32>
    %cst_34 = arith.constant 0.000000e+00 : f32
    %69 = vector.broadcast %cst_34 : f32 to vector<8x128xf32>
    %70 = arith.select %68, %66, %69 : vector<8x128xi1>, vector<8x128xf32>
    %c0_35 = arith.constant 0 : index
    %c5 = arith.constant 5 : index
    %71 = vector.load %arg5[%c0_35, %c5] : memref<8x9xf32, #tpu.memory_space<vmem>>, vector<8x1xf32>
    %72 = vector.broadcast %71 : vector<8x1xf32> to vector<8x128xf32>
    %73 = arith.mulf %70, %72 : vector<8x128xf32>
    %74 = arith.addf %65, %73 : vector<8x128xf32>
    %c0_36 = arith.constant 0 : index
    %c159 = arith.constant 159 : index
    %75 = vector.load %arg10[%c0_36, %c159] : memref<8x384xf32, #tpu.memory_space<vmem>>, vector<8x128xf32>
    %c0_i32_37 = arith.constant 0 : i32
    %76 = vector.broadcast %c0_i32_37 : i32 to vector<8x128xi32>
    %77 = arith.cmpi ne, %27, %76 : vector<8x128xi32>
    %cst_38 = arith.constant 0.000000e+00 : f32
    %78 = vector.broadcast %cst_38 : f32 to vector<8x128xf32>
    %79 = arith.select %77, %75, %78 : vector<8x128xi1>, vector<8x128xf32>
    %c0_39 = arith.constant 0 : index
    %c6 = arith.constant 6 : index
    %80 = vector.load %arg5[%c0_39, %c6] : memref<8x9xf32, #tpu.memory_space<vmem>>, vector<8x1xf32>
    %81 = vector.broadcast %80 : vector<8x1xf32> to vector<8x128xf32>
    %82 = arith.mulf %79, %81 : vector<8x128xf32>
    %83 = arith.addf %74, %82 : vector<8x128xf32>
    %c0_40 = arith.constant 0 : index
    %c160 = arith.constant 160 : index
    %84 = vector.load %arg10[%c0_40, %c160] : memref<8x384xf32, #tpu.memory_space<vmem>>, vector<8x128xf32>
    %c0_41 = arith.constant 0 : index
    %c7 = arith.constant 7 : index
    %85 = vector.load %arg5[%c0_41, %c7] : memref<8x9xf32, #tpu.memory_space<vmem>>, vector<8x1xf32>
    %86 = vector.broadcast %85 : vector<8x1xf32> to vector<8x128xf32>
    %87 = arith.mulf %84, %86 : vector<8x128xf32>
    %88 = arith.addf %83, %87 : vector<8x128xf32>
    %c0_42 = arith.constant 0 : index
    %c161 = arith.constant 161 : index
    %89 = vector.load %arg10[%c0_42, %c161] : memref<8x384xf32, #tpu.memory_space<vmem>>, vector<8x128xf32>
    %c15_i32_43 = arith.constant 15 : i32
    %90 = vector.broadcast %c15_i32_43 : i32 to vector<8x128xi32>
    %91 = arith.cmpi ne, %27, %90 : vector<8x128xi32>
    %cst_44 = arith.constant 0.000000e+00 : f32
    %92 = vector.broadcast %cst_44 : f32 to vector<8x128xf32>
    %93 = arith.select %91, %89, %92 : vector<8x128xi1>, vector<8x128xf32>
    %c0_45 = arith.constant 0 : index
    %c8 = arith.constant 8 : index
    %94 = vector.load %arg5[%c0_45, %c8] : memref<8x9xf32, #tpu.memory_space<vmem>>, vector<8x1xf32>
    %95 = vector.broadcast %94 : vector<8x1xf32> to vector<8x128xf32>
    %96 = arith.mulf %93, %95 : vector<8x128xf32>
    %97 = arith.addf %88, %96 : vector<8x128xf32>
    %c0_46 = arith.constant 0 : index
    %c0_47 = arith.constant 0 : index
    %98 = vector.load %arg6[%c0_46, %c0_47] : memref<8x1xf32, #tpu.memory_space<vmem>>, vector<8x1xf32>
    %99 = vector.broadcast %98 : vector<8x1xf32> to vector<8x128xf32>
    %100 = arith.addf %97, %99 : vector<8x128xf32>
    %cst_48 = arith.constant 0.000000e+00 : f32
    %cst_49 = arith.constant 6.000000e+00 : f32
    %101 = vector.broadcast %cst_48 : f32 to vector<8x128xf32>
    %102 = arith.maximumf %101, %100 : vector<8x128xf32>
    %103 = vector.broadcast %cst_49 : f32 to vector<8x128xf32>
    %104 = arith.minimumf %103, %102 : vector<8x128xf32>
    %c0_50 = arith.constant 0 : index
    %c0_51 = arith.constant 0 : index
    %105 = vector.load %arg7[%c0_50, %c0_51] : memref<4x8xf32, #tpu.memory_space<vmem>>, vector<4x8xf32>
    %cst_52 = arith.constant dense<0.000000e+00> : vector<4x128xf32>
    %106 = tpu.matmul %105, %104, %cst_52 {dimension_numbers = #tpu.dot_dimension_numbers<[1], [0], [0], [1], [0, 0, 1, 1], [], []>} : vector<4x8xf32>, vector<8x128xf32>, vector<4x128xf32> -> vector<4x128xf32>
    %c0_53 = arith.constant 0 : index
    %c0_54 = arith.constant 0 : index
    %107 = vector.load %arg8[%c0_53, %c0_54] : memref<4x1xf32, #tpu.memory_space<vmem>>, vector<4x1xf32>
    %108 = vector.broadcast %107 : vector<4x1xf32> to vector<4x128xf32>
    %109 = arith.addf %106, %108 : vector<4x128xf32>
    %110 = vector.extract_strided_slice %2 {offsets = [0, 16], sizes = [4, 128], strides = [1, 1]} : vector<4x160xf32> to vector<4x128xf32>
    %111 = arith.addf %109, %110 : vector<4x128xf32>
    %c0_55 = arith.constant 0 : index
    %c0_56 = arith.constant 0 : index
    %c0_57 = arith.constant 0 : index
    %112 = vector.load %arg9[%c0_55, %c0_56, %c0_57] : memref<1x4x128xf32, #tpu.memory_space<vmem>>, vector<1x4x128xf32>
    %113 = vector.shape_cast %112 : vector<1x4x128xf32> to vector<4x128xf32>
    %114 = vector.shape_cast %111 : vector<4x128xf32> to vector<1x4x128xf32>
    tpu.vector_store %arg9[%c0_55, %c0_56, %c0_57], %114 {strides = array<i32>} : memref<1x4x128xf32, #tpu.memory_space<vmem>>, vector<1x4x128xf32>,
    return
  }
  func.func @transform_0(%arg0: i32, %arg1: i32) -> (i32, i32, i32, i32) {
    %c0_i32 = arith.constant 0 : i32
    %c0_i32_0 = arith.constant 0 : i32
    %c0_i32_1 = arith.constant 0 : i32
    return %arg0, %arg1, %c0_i32, %c0_i32_0 : i32, i32, i32, i32
  }
  func.func @transform_1(%arg0: i32, %arg1: i32) -> (i32, i32) {
    %c0_i32 = arith.constant 0 : i32
    %c0_i32_0 = arith.constant 0 : i32
    %c0_i32_1 = arith.constant 0 : i32
    return %c0_i32, %c0_i32_0 : i32, i32
  }
  func.func @transform_2(%arg0: i32, %arg1: i32) -> (i32, i32) {
    %c0_i32 = arith.constant 0 : i32
    %c0_i32_0 = arith.constant 0 : i32
    %c0_i32_1 = arith.constant 0 : i32
    return %c0_i32, %c0_i32_0 : i32, i32
  }
  func.func @transform_3(%arg0: i32, %arg1: i32) -> (i32, i32) {
    %c0_i32 = arith.constant 0 : i32
    %c0_i32_0 = arith.constant 0 : i32
    %c0_i32_1 = arith.constant 0 : i32
    return %c0_i32, %c0_i32_0 : i32, i32
  }
  func.func @transform_4(%arg0: i32, %arg1: i32) -> (i32, i32) {
    %c0_i32 = arith.constant 0 : i32
    %c0_i32_0 = arith.constant 0 : i32
    %c0_i32_1 = arith.constant 0 : i32
    return %c0_i32, %c0_i32_0 : i32, i32
  }
  func.func @transform_5(%arg0: i32, %arg1: i32) -> (i32, i32) {
    %c0_i32 = arith.constant 0 : i32
    %c0_i32_0 = arith.constant 0 : i32
    %c0_i32_1 = arith.constant 0 : i32
    return %c0_i32, %c0_i32_0 : i32, i32
  }
  func.func @transform_6(%arg0: i32, %arg1: i32) -> (i32, i32) {
    %c0_i32 = arith.constant 0 : i32
    %c0_i32_0 = arith.constant 0 : i32
    %c0_i32_1 = arith.constant 0 : i32
    return %c0_i32, %c0_i32_0 : i32, i32
  }
  func.func @transform_7(%arg0: i32, %arg1: i32) -> (i32, i32, i32) {
    %c0_i32 = arith.constant 0 : i32
    %c0_i32_0 = arith.constant 0 : i32
    return %arg0, %c0_i32, %arg1 : i32, i32, i32
  }
}

</mosaic_0001>

<bundles_post_ra>
// kernel: tpu_custom_call.1
= control target key start
LH: loop header
LB: loop body
LE: loop exit
PB: predicated region body
PF: predicated region fallthrough
CT: control target
= control target key end

     0   :  { %12 = vsyncpa [#allocation4], 0  ;;  %s1231_s0 = inlined_call_operand.hbm [shape: f32[2,2,4,160], index: 0, kind: input, shape index: {}]   ;;  %s1232_s1 = inlined_call_operand.vmem [shape: f32[8,4], index: 1, kind: input, shape index: {}]   ;;  %s1233_s2 = inlined_call_operand.vmem [shape: f32[8,1], index: 2, kind: input, shape index: {}]   ;;  %s1234_s3 = inlined_call_operand.vmem [shape: f32[8,9], index: 3, kind: input, shape index: {}]   ;;  %s1235_s4 = inlined_call_operand.vmem [shape: f32[8,1], index: 4, kind: input, shape index: {}]   ;;  %s1236_s5 = inlined_call_operand.vmem [shape: f32[4,8], index: 5, kind: input, shape index: {}]   ;;  %s1237_s6 = inlined_call_operand.vmem [shape: f32[4,1], index: 6, kind: input, shape index: {}]   ;;  %s1238_s7 = inlined_call_operand.hbm [shape: f32[2,4,256], index: 7, kind: output, shape index: {}]  }
   0x1   :  { %14 = vsyncpa [#allocation4 + $0x1], 0 }
   0x2   :  { %15 = vsyncpa [#allocation5], 0 }
   0x3   :  { %17 = vsyncpa [#allocation5 + $0x1], 0  ;;  %s1008_s24 = smov 0   ;;  %s1010_s25 = smov 0  }
   0x4   :  { %s1012_s26 = smov 0   ;;  %s1014_s27 = smov 0  }
   0x5   :  { %s1016_s28 = smov 0   ;;  %s1018_s29 = smov 0  }
   0x6   :  { %s1020_s30 = smov 0   ;;  %s1022_s8 = smov 0  }
   0x7 LB: > { %1245 = sst [smem:[#allocation9_spill]] %s921_s24  ;;  %s691_s9 = sadd.s32 4294967295, %s949_s8   ;;  %s949_s8 = sphi %s1022_s8, %s23_s8   ;;  %s945_s30 = sphi %s1020_s30, %s1269_s30   ;;  %s941_s29 = sphi %s1018_s29, %s1268_s29   ;;  %s937_s28 = sphi %s1016_s28, %s1267_s28   ;;  %s933_s27 = sphi %s1014_s27, %s1266_s27   ;;  %s929_s26 = sphi %s1012_s26, %s1265_s26   ;;  %s925_s25 = sphi %s1010_s25, %s1264_s25   ;;  %s921_s24 = sphi %s1008_s24, %s1263_s24  }
   0x8   : > { %s692_s10 = sadd.s32 4294967294, %s949_s8   ;;  %s32_s11 = sadd.s32 1, %s941_s29 }
   0x9   : > { %s35_s12 = sadd.s32 1, %s945_s30  ;;  %p33_p0 = scmp.ge.s32.totalorder %s32_s11, 2 }
   0xa   : > { %s44_s13 = sadd.s32 1, %s929_s26  ;;  %p51_p1 = scmp.ne.s32.totalorder %s929_s26, %s925_s25 }
   0xb   : > { %p52_p2 = scmp.eq.s32.totalorder %s949_s8, 0  ;;  %s1271_s11 = smov (%p33_p0, %s32_s11), 0 }
   0xc   : > { %1246 = sst [smem:[#allocation10_spill]] %s1271_s11  ;;  %s1273_s12 = smov (!%p33_p0, %s35_s12), %s945_s30 }
   0xd   : > { %s40_s14 = ssub.s32 %s941_s29, %s1271_s11  ;;  %p1061_p3 = por %p52_p2, %p51_p1 }
   0xe   : > { %p37_p4 = scmp.ge.s32.totalorder %s1273_s12, 2  ;;  %p57_p5 = scmp.ne.s32.totalorder %s925_s25, %s921_s24 }
   0xf   : > { %p58_p6 = scmp.eq.s32.totalorder %s691_s9, 0  ;;  %p209_p7 = scmp.eq.s32.totalorder %s691_s9, 3 }
  0x10   : > { %s1275_s12 = smov (%p37_p4, %s1273_s12), 0  ;;  %p215_p10 = scmp.eq.s32.totalorder %s692_s10, 3 }
  0x11   : > { %1248 = sst [smem:[#allocation11_spill]] %s1275_s12  ;;  %p1069_p8 = por %p58_p6, %p57_p5 }
  0x12   : > { %p1073_p9 = por %p209_p7, %p51_p1  ;;  %s39_s18 = ssub.s32 %s945_s30, %s1275_s12 }
  0x13   : > { %s41_s19 = sor.u32 %s40_s14, %s39_s18  ;;  %p1079_p12 = por %p215_p10, %p57_p5 }
  0x14   : > { %s1250_s17 = scalar_select %p1073_p9, 1, 0 }
  0x15   : > { %p42_p11 = scmp.eq.s32.totalorder %s41_s19, 0  ;;  %p726_p13 = scmp.lt.s32.totalorder %s949_s8, 4 }
  0x16   : > { %1251 = sst [smem:[#allocation12_spill]] %s1250_s17  ;;  %s253_s21 = sand.u32 1, %s929_s26  }
  0x17   : > { %s1252_s20 = scalar_select %p1079_p12, 1, 0 }
  0x18   : > { %s1086_s22 = scalar_select %p42_p11, %s929_s26, %s44_s13  }
  0x19   : > { %1253 = sst [smem:[#allocation13_spill]] %s1252_s20  ;;  %s695_s23 = sshll.u32 %s253_s21, 3 }
  0x1a   : > { %s696_s9 = sshll.u32 %s941_s29, 1  ;;  %s697_s11 = sshll.u32 %s945_s30, 2 }
  0x1b   : > { %s257_s24 = scalar_lea.vmem [#allocation3], %s695_s23  ;;  %s262_s12 = sadd.s32 %s697_s11, %s696_s9 }
  0x1c   : > { %s268_s17 = sshll.u32 %s257_s24, 4  ;;  %s698_s10 = sshll.u32 %s262_s12, 2  ;;  %s269_s17 = int_to_ptr.vmem [resolvable:$true] %s268_s17 }
  0x1d   : > { %p719_p0 = pnand %p726_p13, %p1061_p3  ;;  %s264_s19 = scalar_lea.hbm %s1231_s0, %s698_s10 }
  0x1e   : > { %p699_p1 = scmp.ge.s32.totalorder %s949_s8, 1  ;;  %s266_s20 = sshll.u32 %s264_s19, 4  ;;  %s267_s20 = int_to_ptr.hbm [resolvable:$true] %s266_s20 }
  0x1f   : > { %p273_p2 = scmp.lt.s32.totalorder %s949_s8, 5  ;;  %s254_s13 = scalar_lea.sflag [#allocation4], %s253_s21 }
  0x20   : > { %721 = dma.hbm_to_vmem [thread:$0]  (!%p719_p0), %s267_s20, 128, %s269_s17, %s254_s13  }
  0x21   : > { %p274_p4 = pnand %p699_p1, %p273_p2 }
  0x22   : > { %s1098_s24 = sand.u32 (!%p274_p4), 1, %s925_s25  }
  0x23   : > { %277 = sbr.rel (%p274_p4) target bundleno = 490 (0x1ea), region = 48  ;;  %s700_s11 = sshll.u32 (!%p274_p4), %s1098_s24, 3 }
  0x24   : > { %s280_s12 = scalar_lea.sflag (!%p274_p4), [#allocation4], %s1098_s24  ;;  %s283_s15 = scalar_lea.vmem (!%p274_p4), [#allocation3], %s700_s11 }
  0x28   : > { %912 = dma.done.wait (%p1069_p8), %s280_s12, 128  }
  0x29   : > { %914 = vsyncadd (%p1069_p8), %s280_s12, 4294967168  ;;  %v951_v0 = vmov 7   ;;  %v952_v1 = vmov 0   ;;  %v316_v2 = vld [vmem:[%s283_s15] sm:$0xff]  ;;  %vm332_vm0 = vcmask 1043456   ;;  %vm328_vm1 = vcmask 31744  }
  0x2a   : > { %811 = vset.pattern.permute.xlu1 %v951_v0  ;;  %809 = vset.pattern.permute.xlu0 %v952_v1  ;;  %v1111_v3 = vld [vmem:[%s1234_s3] sm:$0xff]  ;;  %325 = vst [vmem:[#allocation1] ss:$2 sm:$0xff] %v316_v2  ;;  %v402_v6 = vld [vmem:[#allocation2] sm:$0xff]  ;;  %s953_s10 = smov 1   ;;  %v954_v9 = vmov 4   ;;  %v381_v15 = vlaneseq }
  0x2b   : > { %812 = vset.pattern.permute.xlu2 %v952_v1  ;;  %507 = vperm.xlu1 %811, %v1111_v3   ;;  %v318_v4 = vld [vmem:[%s1233_s2] sm:$0xff]  ;;  %v955_v10 = vmov 1   ;;  %v956_v11 = vmov 2   ;;  %v957_v12 = vmov 3   ;;  %v958_v13 = vmov 6   ;;  %s702_s14 = sshll.u32 %s933_s27, 3 }
  0x2c   : > { %418 = vperm.xlu2 %812, %v1111_v3   ;;  %321 = vperm.xlu0 %809, %v318_v4   ;;  %v317_v5 = vld [vmem:[%s1232_s1] sm:$0xff]  ;;  %v959_v14 = vmov 5   ;;  %p384_p3 = scmp.eq.s32.totalorder %s933_s27, 0  ;;  %s386_s18 = ssub.s32 17, %s702_s14  ;;  %v1131_v16 = vand.u32 127, %v381_v15  ;;  %vm399_vm8 = vcmask 261120  }
  0x2d   : > { %s707_s13 = sshll.u32 %s386_s18, 4  ;;  %s960_s11 = smov 97   ;;  %v961_v31 = vmov 8   ;;  %v536_v37 = vld [vmem:[%s1235_s4] sm:$0xff]  ;;  %vm411_vm9 = vcmask 7168   ;;  %vm438_vm10 = vcmask 1039360  }
  0x2e   : > { %s385_s19 = scalar_select %p384_p3, 16, 0  ;;  %v391_v18 = vstv %s707_s13  ;;  %v383_v19 = vadd.s32 128, %v1131_v16  ;;  %v546_v40 = vld [vmem:[%s1237_s6] sm:$0xf]  ;;  %v401_v54 = vand.u32 15, %v1131_v16 }
  0x2f   : > { %vm392_vm3 = vcmp.lt.s32.totalorder %v1131_v16, %v391_v18  ;;  %s962_s12 = smov 112   ;;  %s963_s15 = smov 127   ;;  %vm452_vm12 = vcmask 924672   ;;  %vm482_vm14 = vcmask 908288   ;;  %vm474_vm15 = vcmask 916480  }
  0x30   : > { %v388_v17 = vstv %s385_s19  ;;  %vm393_vm5 = vcmp.lt.s32.totalorder %v383_v19, %v391_v18  ;;  %s964_s17 = smov 96   ;;  %s965_s20 = smov 113   ;;  %vm1158_vm11 = vcmp.ne.s32.totalorder %v401_v54, 0  ;;  %vm1162_vm13 = vcmp.ne.s32.totalorder %v401_v54, 15 }
  0x31   : > { %v326_v7 = vld.sshfl [vmem:[#allocation1] sm:$0xff pattern:$0x75316420]  ;;  %v327_v8 = vld.sshfl [vmem:[#allocation1 + $0x8] sm:$0xff pattern:$0x75316420]  ;;  %vm389_vm2 = vcmp.ge.s32.totalorder %v1131_v16, %v388_v17  ;;  %vm390_vm4 = vcmp.ge.s32.totalorder %v383_v19, %v388_v17 }
  0x32   : > { %703 = vmatpush.msk.msra.mxu0 %vm332_vm0, %v326_v7  ;;  %705 = vmatpush.msk.msra.mxu1 %vm332_vm0, %v327_v8  ;;  %576 = vst [vmem:[#allocation1] ss:$2 sm:$0xff] %v316_v2  ;;  %vm394_vm6 = vmand %vm389_vm2, %vm392_vm3  ;;  %s966_s16 = smov 111   ;;  %s967_s9 = smov 95   ;;  %vm496_vm0 = vcmask 793600   ;;  %vm518_vm2 = vcmask 785408  }
  0x33   : > { %704 = vmatmul.msk.f32.vlgmr.msra.gmra.mxu0 %vm328_vm1, %v317_v5  ;;  %706 = vmatmul.msk.f32.vlgmr.msra.gmra.mxu1 %vm328_vm1, %v317_v5  ;;  %vm395_vm7 = vmand %vm390_vm4, %vm393_vm5  ;;  %vm526_vm1 = vcmask 777216   ;;  %vm552_vm3 = vcmask 64512   ;;  %s710_s13 = sshll.u32 %s937_s28, 1 }
  0x34   : > { %407 = vrot.lane.b32.xlu1 %v402_v6, %s953_s10  ;;  %810 = vset.pattern.permute.xlu0 %v954_v9 }
  0x35   : > { %813 = vset.pattern.permute.xlu1 %v955_v10  ;;  %463 = vperm.xlu0 %810, %v1111_v3  }
  0x39   : > { %v578_v4 = vld.sshfl [vmem:[#allocation1 + $0x8] sm:$0xff pattern:$0x75316420] }
  0x3c   : > { %424 = vperm.xlu1 %813, %v1111_v3  }
  0x3d   : > { %816 = vset.pattern.permute.xlu0 %v959_v14 }
  0x3e   : > { %487 = vperm.xlu0 %816, %v1111_v3  }
  0x44   : > { %814 = vset.pattern.permute.xlu1 %v956_v11 }
  0x45   : > { %443 = vperm.xlu1 %814, %v1111_v3  }
  0x46   : > { %818 = vset.pattern.permute.xlu0 %v961_v31 }
  0x4d   : > { %815 = vset.pattern.permute.xlu1 %v957_v12 }
  0x4e   : > { %457 = vperm.xlu1 %815, %v1111_v3  }
  0x56   : > { %817 = vset.pattern.permute.xlu1 %v958_v13 }
  0x57   : > { %501 = vperm.xlu1 %817, %v1111_v3  }
  0x5f   : > { %819 = vset.pattern.permute.xlu1 %v952_v1 }
  0x86   : > { %v419_v41 = vpop.permute.xlu2 %418 }
  0x9d   : > { %v508_v35 = vpop.permute.xlu1 %507 }
  0x9e   : > { %v322_v20 = vpop.permute.xlu0 %321 }
  0xa6   : > { %v408_v42 = vpop.permute.xlu1 %407 }
  0xa7   : > { %v464_v32 = vpop.permute.xlu0 %463 }
  0xae   : > { %v425_v44 = vpop.permute.xlu1 %424 }
  0xb0   : > { %v354_v21 = vpop.f32.mrf.mxu0  ;;  %v374_v22 = vpop.f32.mrf.mxu1 }
  0xb1   : > { %v355_v23 = vadd.f32 %v354_v21, %v322_v20  ;;  %v375_v24 = vadd.f32 %v374_v22, %v322_v20  ;;  %v488_v49 = vpop.permute.xlu0 %487 }
  0xb3   : > { %v377_v25 = vmax.f32 %v355_v23, 0.0  ;;  %v378_v26 = vmax.f32 %v375_v24, 0.0 }
  0xb5   : > { %v379_v27 = vmin.f32 %v377_v25, 6.0  ;;  %v380_v28 = vmin.f32 %v378_v26, 6.0 }
  0xb7   : > { %v1136_v29 = vsel %vm394_vm6, %v379_v27, 0.0  ;;  %v397_v30 = vsel %vm395_vm7, %v380_v28, 0.0  ;;  %v444_v46 = vpop.permute.xlu1 %443 }
  0xb8   : > { %492 = vrot.lane.b32.xlu1 %v1136_v29, %s960_s11  ;;  %409 = vrot.lane.b32.xlu2 %v1136_v29, %s953_s10  ;;  %400 = vst.msk [vmem:[#allocation2 + $0x10] sm:$0xff] %vm399_vm8, %v397_v30  ;;  %v466_v33 = vmul.f32 %v464_v32, %v1136_v29  ;;  %v510_v36 = vmul.f32 %v508_v35, %v1136_v29 }
  0xb9   : > { %v427_v5 = vmul.f32 %v425_v44, %v1136_v29 }
  0xbf   : > { %v430_v34 = vld [vmem:[#allocation2 + $0x10] sm:$0xff] }
  0xc0   : > { %470 = vrot.lane.b32.xlu1 %v466_v33, %s962_s12  ;;  %434 = vrot.lane.b32.xlu2 %v1136_v29, %s963_s15  ;;  %v467_v38 = vmul.f32 %v464_v32, %v430_v34  ;;  %v511_v39 = vmul.f32 %v508_v35, %v430_v34  ;;  %v458_v48 = vpop.permute.xlu1 %457 }
  0xc1   : > { %436 = vrot.lane.b32.xlu0 %v430_v34, %s963_s15 }
  0xc8   : > { %514 = vrot.lane.b32.xlu1 %v510_v36, %s964_s17  ;;  %448 = vrot.lane.b32.xlu2 %v1136_v29, %s965_s20 }
  0xc9   : > { %450 = vrot.lane.b32.xlu0 %v430_v34, %s965_s20  ;;  %v502_v51 = vpop.permute.xlu1 %501 }
  0xd0   : > { %478 = vrot.lane.b32.xlu2 %v1136_v29, %s966_s16  ;;  %539 = vperm.xlu1 %819, %v536_v37  }
  0xd1   : > { %480 = vrot.lane.b32.xlu0 %v430_v34, %s966_s16 }
  0xd8   : > { %494 = vrot.lane.b32.xlu2 %v430_v34, %s960_s11  ;;  %s598_s11 = sadd.s32 %s933_s27, %s710_s13  ;;  %s588_s27 = scalar_lea.sflag [#allocation5], %s1098_s24 }
  0xd9   : > { %524 = vrot.lane.b32.xlu0 %v430_v34, %s967_s9  ;;  %s711_s15 = sshll.u32 %s598_s11, 2  ;;  %s871_s13 = scalar_lea.hbm %s1238_s7, 16 }
  0xda   : > { %s600_s21 = scalar_lea.hbm %s1238_s7, %s711_s15 }
  0xdb   : > { %s604_s10 = sshll.u32 %s600_s21, 4  ;;  %s605_s10 = int_to_ptr.hbm [resolvable:$true] %s604_s10 }
  0xdc   : > { %s865_s28 = sshra.s32 %s605_s10, 4  ;;  %s866_s28 = int_to_ptr.hbm [resolvable:$true] %s865_s28 }
  0xdd   : > { %s867_s14 = scalar_lea.hbm %s866_s28, 4  ;;  %p872_p8 = scmp.lt.s32.totalorder %s866_s28, %s1238_s7 }
  0xde   : > { %p868_p5 = scmp.ne.s32.totalorder %s866_s28, %s867_s14  ;;  %p873_p10 = scmp.lt.s32.totalorder %s871_s13, %s867_s14 }
  0xe0   : > { %522 = vrot.lane.b32.xlu2 %v1136_v29, %s967_s9  ;;  %p869_p6 = pnand %p868_p5, %p1073_p9  ;;  %p874_p11 = por %p873_p10, %p872_p8 }
  0xe1   : > { %531 = vperm.xlu0 %818, %v1111_v3   ;;  %v577_v3 = vld.sshfl [vmem:[#allocation1] sm:$0xff pattern:$0x75316420] }
  0xe2   : > { %579 = vrot.lane.b32.xlu1 %v577_v3, %s962_s12  ;;  %p870_p7 = pneg %p869_p6 }
  0xe4   : > { %p875_p13 = pnand %p874_p11, %p870_p7 }
  0xe8   : > { %472 = vrot.lane.b32.xlu2 %v467_v38, %s962_s12  ;;  %v545_v38 = vld [vmem:[%s1236_s5] sm:$0xf] }
  0xe9   : > { %820 = vset.pattern.permute.xlu0 %v952_v1 }
  0xf0   : > { %516 = vrot.lane.b32.xlu2 %v511_v39, %s964_s17 }
  0xf8   : > { %549 = vperm.xlu2 %812, %v546_v40  }
 0x100   : > { %581 = vrot.lane.b32.xlu2 %v578_v4, %s962_s12  ;;  %s701_s12 = sshll.u32 %s1098_s24, 2 }
 0x101   : > { %s314_s16 = scalar_lea.vmem [#allocation6], %s701_s12 }
 0x102   : > { %s602_s9 = sshll.u32 %s314_s16, 4  ;;  %s603_s9 = int_to_ptr.vmem [resolvable:$true] %s602_s9 }
 0x112   : > { %v410_v43 = vpop.permute.xlu2 %409 }
 0x113   : > { %v412_v56 = vsel %vm411_vm9, %v408_v42, %v410_v43 }
 0x114   : > { %v414_v61 = vsel %vm1158_vm11, %v412_v56, 0.0 }
 0x115   : > { %v421_v1 = vmul.f32 %v419_v41, %v414_v61 }
 0x117   : > { %v428_v7 = vadd.f32 %v427_v5, %v421_v1 }
 0x11a   : > { %v435_v45 = vpop.permute.xlu2 %434 }
 0x122   : > { %v449_v47 = vpop.permute.xlu2 %448 }
 0x12a   : > { %v479_v50 = vpop.permute.xlu2 %478  ;;  %v493_v57 = vpop.permute.xlu1 %492 }
 0x132   : > { %v495_v52 = vpop.permute.xlu2 %494  ;;  %v471_v10 = vpop.permute.xlu1 %470 }
 0x133   : > { %v437_v53 = vpop.permute.xlu0 %436  ;;  %v497_v17 = vsel %vm496_vm0, %v493_v57, %v495_v52 }
 0x134   : > { %v439_v59 = vsel %vm438_vm10, %v435_v45, %v437_v53  ;;  %v499_v20 = vsel %vm1158_vm11, %v497_v17, 0.0 }
 0x135   : > { %v441_v0 = vsel %vm1162_vm13, %v439_v59, 0.0  ;;  %v504_v24 = vmul.f32 %v502_v51, %v499_v20 }
 0x136   : > { %v446_v6 = vmul.f32 %v444_v46, %v441_v0 }
 0x138   : > { %v447_v12 = vadd.f32 %v446_v6, %v428_v7 }
 0x13a   : > { %v523_v60 = vpop.permute.xlu2 %522  ;;  %v515_v23 = vpop.permute.xlu1 %514 }
 0x13b   : > { %v451_v62 = vpop.permute.xlu0 %450 }
 0x13c   : > { %v453_v63 = vsel %vm452_vm12, %v449_v47, %v451_v62 }
 0x13d   : > { %v455_v2 = vsel %vm1158_vm11, %v453_v63, 0.0 }
 0x13e   : > { %v460_v8 = vmul.f32 %v458_v48, %v455_v2 }
 0x140   : > { %v461_v16 = vadd.f32 %v460_v8, %v447_v12 }
 0x142   : > { %v473_v9 = vpop.permute.xlu2 %472  ;;  %v540_v33 = vpop.permute.xlu1 %539 }
 0x143   : > { %v481_v11 = vpop.permute.xlu0 %480  ;;  %v475_v15 = vsel %vm474_vm15, %v471_v10, %v473_v9 }
 0x144   : > { %v483_v13 = vsel %vm482_vm14, %v479_v50, %v481_v11  ;;  %v477_v19 = vadd.f32 %v475_v15, %v461_v16 }
 0x145   : > { %v485_v14 = vsel %vm1162_vm13, %v483_v13, 0.0 }
 0x146   : > { %v490_v18 = vmul.f32 %v488_v49, %v485_v14 }
 0x148   : > { %v491_v22 = vadd.f32 %v490_v18, %v477_v19 }
 0x14a   : > { %v517_v25 = vpop.permute.xlu2 %516  ;;  %v505_v27 = vadd.f32 %v504_v24, %v491_v22 }
 0x14b   : > { %v525_v21 = vpop.permute.xlu0 %524  ;;  %v519_v28 = vsel %vm518_vm2, %v515_v23, %v517_v25 }
 0x14c   : > { %v527_v26 = vsel %vm526_vm1, %v523_v60, %v525_v21  ;;  %v521_v32 = vadd.f32 %v519_v28, %v505_v27 }
 0x14d   : > { %v529_v30 = vsel %vm1162_vm13, %v527_v26, 0.0 }
 0x152   : > { %v550_v39 = vpop.permute.xlu2 %549 }
 0x153   : > { %v532_v29 = vpop.permute.xlu0 %531 }
 0x154   : > { %v534_v31 = vmul.f32 %v532_v29, %v529_v30  ;;  %v580_v40 = vpop.permute.xlu1 %579 }
 0x156   : > { %v535_v34 = vadd.f32 %v534_v31, %v521_v32 }
 0x158   : > { %v542_v35 = vadd.f32 %v540_v33, %v535_v34 }
 0x15a   : > { %v543_v36 = vmax.f32 %v542_v35, 0.0  ;;  %v582_v41 = vpop.permute.xlu2 %581 }
 0x15b   : > { %v583_v43 = vsel %vm474_vm15, %v580_v40, %v582_v41 }
 0x15c   : > { %v544_v37 = vmin.f32 %v543_v36, 6.0 }
 0x15e   : > { %571 = vmatpush.msra.mxu2 %v544_v37 }
 0x15f   : > { %708 = vmatmul.msk.f32.vlgmr.msra.gmra.mxu2 %vm552_vm3, %v545_v38 }
 0x1e2   : > { %v573_v42 = vpop.f32.mrf.mxu2 }
 0x1e3   : > { %v574_v44 = vadd.f32 %v573_v42, %v550_v39 }
 0x1e5   : > { %v585_v45 = vadd.f32 %v583_v43, %v574_v44 }
 0x1e7   : > { %586 = vst [vmem:[%s314_s16] sm:$0xf] %v585_v45 }
 0x1e8   : > { %878 = shalt.err (!%p875_p13)
}
 0x1e9   : > { %716 = dma.vmem_to_hbm [thread:$0]  (%p1073_p9), %s603_s9, 64, %s605_s10, %s588_s27  }
 0x1ea PF: > { %s1259_s24 = sld [smem:[#allocation9_spill]]  ;;  %p727_p0 = scmp.ge.s32.totalorder %s949_s8, 2 }
 0x1ec   : > { %p723_p1 = pnand %p727_p0, %p1079_p12 }
 0x1ee   : > { %p724_p2 = pneg %p723_p1 }
 0x1f0   : > { %s616_s17 = sand.u32 1, %s1259_s24  }
 0x1f1   : > { %s617_s20 = scalar_lea.sflag [#allocation5], %s616_s17 }
 0x1f2   : > { %916 = dma.done.wait (%p724_p2), %s617_s20, 64  }
 0x1f3   : > { %918 = vsyncadd (%p724_p2), %s617_s20, 4294967232  ;;  %s23_s8 = sadd.s32 1, %s949_s8   ;;  %s1261_s21 = sld [smem:[#allocation10_spill]] }
 0x1f4   : > { %p20_p4 = scmp.ge.s32.totalorder %s23_s8, 6   ;;  %s1262_s23 = sld [smem:[#allocation11_spill]] }
 0x1f5   : > { %s1263_s24 = smov %s925_s25  ;;  %s1264_s25 = smov %s929_s26 }
 0x1f6   : > { %s1265_s26 = smov %s1086_s22  ;;  %s1266_s27 = smov %s941_s29 }
 0x1f7   : > { %s1267_s28 = smov %s945_s30  ;;  %22 = sbr.rel (!%p20_p4) target bundleno = 7 (0x7), region = 93 }
 0x1f9   : > { %s1268_s29 = smov %s1261_s21 }
 0x1fa   : > { %s1269_s30 = smov %s1262_s23 }
 0x1fc   :  { %623 = vsyncpa [#allocation4], 1 }
 0x1fd   :  { %625 = vsyncpa [#allocation4 + $0x1], 1 }
 0x1fe   :  { %626 = vsyncpa [#allocation5], 1 }
 0x1ff   :  { %628 = vsyncpa [#allocation5 + $0x1], 1 }

</bundles_post_ra>
